<compile_context>
chip_gen: v5e
topology: v5e:2x2
jax: 0.10.0
libtpu: 0.0.40
codegen_flags: <defaults>
</compile_context>

<pallas_src>
import functools

import jax
import jax.numpy as jnp
from jax.experimental import pallas as pl
from jax.experimental.pallas import tpu as pltpu


def _round_up(x, m):
    return ((x + m - 1) // m) * m


# ----------------------------------------------------------------------------
# Parameter initialization (torch.nn.GRUCell-style layout and init)
# ----------------------------------------------------------------------------
def gru_cell_params(key, input_dim, hidden_dim):
    """Returns (w_ih (3D, in), w_hh (3D, D), b_ih (3D,), b_hh (3D,)), gate order r,z,n."""
    k = jax.random.split(key, 4)
    bound = 1.0 / (hidden_dim ** 0.5)
    w_ih = jax.random.uniform(k[0], (3 * hidden_dim, input_dim), jnp.float32, -bound, bound)
    w_hh = jax.random.uniform(k[1], (3 * hidden_dim, hidden_dim), jnp.float32, -bound, bound)
    b_ih = jax.random.uniform(k[2], (3 * hidden_dim,), jnp.float32, -bound, bound)
    b_hh = jax.random.uniform(k[3], (3 * hidden_dim,), jnp.float32, -bound, bound)
    return (w_ih, w_hh, b_ih, b_hh)


# ----------------------------------------------------------------------------
# Pallas kernel: one row-tile of the GRU cell.
#   x_ref   : (tm, Ip)       messages (lane-padded input)
#   h_ref   : (tm, Dp)       node states (lane-padded hidden)
#   wih_ref : (Ip, 3*Dp)     input weights, transposed, gate-major
#   whh_ref : (Dp, 3*Dp)     hidden weights, transposed, gate-major
#   bih/bhh : (1, 3*Dp)      biases, gate-major
#   out_ref : (tm, Dp)       new node states
# ----------------------------------------------------------------------------
def gru_cell_kernel(x_ref, h_ref, wih_ref, whh_ref, bih_ref, bhh_ref, out_ref, *, dp):
    x = x_ref[...]
    h = h_ref[...]

    # One fused matmul per operand family; gate-major output -> 128-aligned slices.
    gi = jnp.dot(x, wih_ref[...], preferred_element_type=jnp.float32) + bih_ref[...]
    gh = jnp.dot(h, whh_ref[...], preferred_element_type=jnp.float32) + bhh_ref[...]

    r = jax.nn.sigmoid(gi[:, :dp] + gh[:, :dp])
    z = jax.nn.sigmoid(gi[:, dp:2 * dp] + gh[:, dp:2 * dp])
    n = jnp.tanh(gi[:, 2 * dp:] + r * gh[:, 2 * dp:])

    out_ref[...] = ((1.0 - z) * n + z * h).astype(out_ref.dtype)


# ----------------------------------------------------------------------------
# Wrapper: flatten (b, n, d) -> (b*n, d), pad to lane/sublane alignment, call
# the kernel over row tiles, reshape back.
# ----------------------------------------------------------------------------
def gru_forward(params, messages, node_states, *, row_tile=512):
    B, N, in_dim = messages.shape
    _, _, D = node_states.shape
    w_ih, w_hh, b_ih, b_hh = params

    Dp = _round_up(D, 128)
    Ip = _round_up(in_dim, 128)

    # Pack weights once (plain-JAX glue): transpose, lane-pad, gate-major concat.
    def pack_w(w, fan_in, fan_in_pad):              # (3D, fan_in) -> (fan_in_pad, 3*Dp)
        w3 = w.reshape(3, D, fan_in)
        w3 = jnp.transpose(w3, (2, 0, 1))           # (fan_in, 3, D)
        w3 = jnp.pad(w3, ((0, fan_in_pad - fan_in), (0, 0), (0, Dp - D)))
        return w3.reshape(fan_in_pad, 3 * Dp)

    def pack_b(b):                                  # (3D,) -> (1, 3*Dp)
        b3 = jnp.pad(b.reshape(3, D), ((0, 0), (0, Dp - D)))
        return b3.reshape(1, 3 * Dp)

    wih_t = pack_w(w_ih, in_dim, Ip)
    whh_t = pack_w(w_hh, D, Dp)
    bih = pack_b(b_ih)
    bhh = pack_b(b_hh)

    # Flatten rows and pad to the row tile / lane widths.
    R = B * N
    x = jnp.pad(messages.reshape(R, in_dim).astype(jnp.float32),
                ((0, 0), (0, Ip - in_dim)))
    h = jnp.pad(node_states.reshape(R, D).astype(jnp.float32),
                ((0, 0), (0, Dp - D)))

    tm = min(row_tile, _round_up(R, 8))             # multiple of 8 sublanes
    Rp = _round_up(R, tm)
    if Rp != R:
        x = jnp.pad(x, ((0, Rp - R), (0, 0)))
        h = jnp.pad(h, ((0, Rp - R), (0, 0)))

    kernel = functools.partial(gru_cell_kernel, dp=Dp)

    out = pl.pallas_call(
        kernel,
        out_shape=jax.ShapeDtypeStruct((Rp, Dp), jnp.float32),
        grid=(Rp // tm,),
        in_specs=[
            pl.BlockSpec((tm, Ip), lambda i: (i, 0)),        # messages tile
            pl.BlockSpec((tm, Dp), lambda i: (i, 0)),        # node-state tile
            pl.BlockSpec((Ip, 3 * Dp), lambda i: (0, 0)),    # W_ih (pinned)
            pl.BlockSpec((Dp, 3 * Dp), lambda i: (0, 0)),    # W_hh (pinned)
            pl.BlockSpec((1, 3 * Dp), lambda i: (0, 0)),     # b_ih
            pl.BlockSpec((1, 3 * Dp), lambda i: (0, 0)),     # b_hh
        ],
        out_specs=pl.BlockSpec((tm, Dp), lambda i: (i, 0)),
        compiler_params=pltpu.CompilerParams(
            dimension_semantics=("parallel",),
            vmem_limit_bytes=64 * 1024 * 1024,
        ),
    )(x, h, wih_t, whh_t, bih, bhh)

    return out[:R, :D].reshape(B, N, D)


# ----------------------------------------------------------------------------
# Pure-JAX reference (matches torch.nn.GRUCell exactly)
# ----------------------------------------------------------------------------
def gru_ref(params, messages, node_states):
    w_ih, w_hh, b_ih, b_hh = params
    B, N, D = node_states.shape
    x = messages.reshape(B * N, -1)
    h = node_states.reshape(B * N, D)
    gi = x @ w_ih.T + b_ih
    gh = h @ w_hh.T + b_hh
    i_r, i_z, i_n = jnp.split(gi, 3, axis=-1)
    h_r, h_z, h_n = jnp.split(gh, 3, axis=-1)
    r = jax.nn.sigmoid(i_r + h_r)
    z = jax.nn.sigmoid(i_z + h_z)
    n = jnp.tanh(i_n + r * h_n)
    hp = (1.0 - z) * n + z * h
    return hp.reshape(B, N, D)


# ----------------------------------------------------------------------------
if __name__ == "__main__":
    # Small shapes consistent with the module: batch=2, nodes=8,
    # hidden_dim=32, message (input) dim = 2 * hidden_dim = 64.
    B, N = 2, 8
    hidden_dim = 32
    input_dim = 2 * hidden_dim

    key = jax.random.PRNGKey(0)
    k_msg, k_h, k_par = jax.random.split(key, 3)
    messages = jax.random.normal(k_msg, (B, N, input_dim), jnp.float32)
    node_states = jax.random.normal(k_h, (B, N, hidden_dim), jnp.float32)
    params = gru_cell_params(k_par, input_dim, hidden_dim)

    out = gru_forward(params, messages, node_states)
    out = jax.block_until_ready(out)

    ref = gru_ref(params, messages, node_states)
    assert out.shape == (B, N, hidden_dim)
    assert jnp.all(jnp.isfinite(out))
    assert jnp.allclose(out, ref, atol=1e-5, rtol=1e-5), float(jnp.max(jnp.abs(out - ref)))
    print("KERNEL_OK")
</pallas_src>

<mosaic_0001>
module attributes {stable_mosaic.version = 11 : i64} {
  func.func @gru_cell_kernel(%arg0: i32, %arg1: memref<16x128xf32, #tpu.memory_space<vmem>>, %arg2: memref<16x128xf32, #tpu.memory_space<vmem>>, %arg3: memref<128x384xf32, #tpu.memory_space<vmem>>, %arg4: memref<128x384xf32, #tpu.memory_space<vmem>>, %arg5: memref<1x384xf32, #tpu.memory_space<vmem>>, %arg6: memref<1x384xf32, #tpu.memory_space<vmem>>, %arg7: memref<16x128xf32, #tpu.memory_space<vmem>>) attributes {dimension_semantics = [#tpu.dimension_semantics<parallel>], iteration_bounds = array<i64: 1>, scalar_prefetch = 0 : i64, scratch_operands = 0 : i64, tpu.core_type = #tpu.core_type<tc>, window_params = [{transform_indices = @transform_0, window_bounds = array<i64: 16, 128>}, {transform_indices = @transform_1, window_bounds = array<i64: 16, 128>}, {pipeline_mode = #tpu.pipeline_mode<synchronous>, transform_indices = @transform_2, window_bounds = array<i64: 128, 384>}, {pipeline_mode = #tpu.pipeline_mode<synchronous>, transform_indices = @transform_3, window_bounds = array<i64: 128, 384>}, {pipeline_mode = #tpu.pipeline_mode<synchronous>, transform_indices = @transform_4, window_bounds = array<i64: 1, 384>}, {pipeline_mode = #tpu.pipeline_mode<synchronous>, transform_indices = @transform_5, window_bounds = array<i64: 1, 384>}, {transform_indices = @transform_6, window_bounds = array<i64: 16, 128>}]} {
    %c0 = arith.constant 0 : index
    %c0_0 = arith.constant 0 : index
    %0 = vector.load %arg1[%c0, %c0_0] : memref<16x128xf32, #tpu.memory_space<vmem>>, vector<16x128xf32>
    %c0_1 = arith.constant 0 : index
    %c0_2 = arith.constant 0 : index
    %1 = vector.load %arg2[%c0_1, %c0_2] : memref<16x128xf32, #tpu.memory_space<vmem>>, vector<16x128xf32>
    %c0_3 = arith.constant 0 : index
    %c0_4 = arith.constant 0 : index
    %2 = vector.load %arg3[%c0_3, %c0_4] : memref<128x384xf32, #tpu.memory_space<vmem>>, vector<128x384xf32>
    %cst = arith.constant dense<0.000000e+00> : vector<16x384xf32>
    %3 = tpu.matmul %0, %2, %cst {dimension_numbers = #tpu.dot_dimension_numbers<[1], [0], [0], [1], [0, 0, 1, 1], [], []>} : vector<16x128xf32>, vector<128x384xf32>, vector<16x384xf32> -> vector<16x384xf32>
    %c0_5 = arith.constant 0 : index
    %c0_6 = arith.constant 0 : index
    %4 = vector.load %arg5[%c0_5, %c0_6] : memref<1x384xf32, #tpu.memory_space<vmem>>, vector<1x384xf32>
    %5 = vector.broadcast %4 : vector<1x384xf32> to vector<16x384xf32>
    %6 = arith.addf %3, %5 : vector<16x384xf32>
    %c0_7 = arith.constant 0 : index
    %c0_8 = arith.constant 0 : index
    %7 = vector.load %arg4[%c0_7, %c0_8] : memref<128x384xf32, #tpu.memory_space<vmem>>, vector<128x384xf32>
    %cst_9 = arith.constant dense<0.000000e+00> : vector<16x384xf32>
    %8 = tpu.matmul %1, %7, %cst_9 {dimension_numbers = #tpu.dot_dimension_numbers<[1], [0], [0], [1], [0, 0, 1, 1], [], []>} : vector<16x128xf32>, vector<128x384xf32>, vector<16x384xf32> -> vector<16x384xf32>
    %c0_10 = arith.constant 0 : index
    %c0_11 = arith.constant 0 : index
    %9 = vector.load %arg6[%c0_10, %c0_11] : memref<1x384xf32, #tpu.memory_space<vmem>>, vector<1x384xf32>
    %10 = vector.broadcast %9 : vector<1x384xf32> to vector<16x384xf32>
    %11 = arith.addf %8, %10 : vector<16x384xf32>
    %12 = vector.extract_strided_slice %6 {offsets = [0, 0], sizes = [16, 128], strides = [1, 1]} : vector<16x384xf32> to vector<16x128xf32>
    %13 = vector.extract_strided_slice %11 {offsets = [0, 0], sizes = [16, 128], strides = [1, 1]} : vector<16x384xf32> to vector<16x128xf32>
    %14 = arith.addf %12, %13 : vector<16x128xf32>
    %15 = arith.negf %14 : vector<16x128xf32>
    %16 = math.exp %15 : vector<16x128xf32>
    %cst_12 = arith.constant 1.000000e+00 : f32
    %17 = vector.broadcast %cst_12 : f32 to vector<16x128xf32>
    %18 = arith.addf %17, %16 : vector<16x128xf32>
    %19 = arith.divf %17, %18 : vector<16x128xf32>
    %20 = vector.extract_strided_slice %6 {offsets = [0, 128], sizes = [16, 128], strides = [1, 1]} : vector<16x384xf32> to vector<16x128xf32>
    %21 = vector.extract_strided_slice %11 {offsets = [0, 128], sizes = [16, 128], strides = [1, 1]} : vector<16x384xf32> to vector<16x128xf32>
    %22 = arith.addf %20, %21 : vector<16x128xf32>
    %23 = arith.negf %22 : vector<16x128xf32>
    %24 = math.exp %23 : vector<16x128xf32>
    %cst_13 = arith.constant 1.000000e+00 : f32
    %25 = vector.broadcast %cst_13 : f32 to vector<16x128xf32>
    %26 = arith.addf %25, %24 : vector<16x128xf32>
    %27 = arith.divf %25, %26 : vector<16x128xf32>
    %28 = vector.extract_strided_slice %6 {offsets = [0, 256], sizes = [16, 128], strides = [1, 1]} : vector<16x384xf32> to vector<16x128xf32>
    %29 = vector.extract_strided_slice %11 {offsets = [0, 256], sizes = [16, 128], strides = [1, 1]} : vector<16x384xf32> to vector<16x128xf32>
    %30 = arith.mulf %19, %29 : vector<16x128xf32>
    %31 = arith.addf %28, %30 : vector<16x128xf32>
    %32 = math.tanh %31 : vector<16x128xf32>
    %cst_14 = arith.constant 1.000000e+00 : f32
    %33 = vector.broadcast %cst_14 : f32 to vector<16x128xf32>
    %34 = arith.subf %33, %27 : vector<16x128xf32>
    %35 = arith.mulf %34, %32 : vector<16x128xf32>
    %36 = arith.mulf %27, %1 : vector<16x128xf32>
    %37 = arith.addf %35, %36 : vector<16x128xf32>
    %c0_15 = arith.constant 0 : index
    %c0_16 = arith.constant 0 : index
    %38 = vector.load %arg7[%c0_15, %c0_16] : memref<16x128xf32, #tpu.memory_space<vmem>>, vector<16x128xf32>
    tpu.vector_store %arg7[%c0_15, %c0_16], %37 {strides = array<i32>} : memref<16x128xf32, #tpu.memory_space<vmem>>, vector<16x128xf32>,
    return
  }
  func.func @transform_0(%arg0: i32) -> (i32, i32) {
    %c0_i32 = arith.constant 0 : i32
    %c0_i32_0 = arith.constant 0 : i32
    return %arg0, %c0_i32 : i32, i32
  }
  func.func @transform_1(%arg0: i32) -> (i32, i32) {
    %c0_i32 = arith.constant 0 : i32
    %c0_i32_0 = arith.constant 0 : i32
    return %arg0, %c0_i32 : i32, i32
  }
  func.func @transform_2(%arg0: i32) -> (i32, i32) {
    %c0_i32 = arith.constant 0 : i32
    %c0_i32_0 = arith.constant 0 : i32
    %c0_i32_1 = arith.constant 0 : i32
    return %c0_i32, %c0_i32_0 : i32, i32
  }
  func.func @transform_3(%arg0: i32) -> (i32, i32) {
    %c0_i32 = arith.constant 0 : i32
    %c0_i32_0 = arith.constant 0 : i32
    %c0_i32_1 = arith.constant 0 : i32
    return %c0_i32, %c0_i32_0 : i32, i32
  }
  func.func @transform_4(%arg0: i32) -> (i32, i32) {
    %c0_i32 = arith.constant 0 : i32
    %c0_i32_0 = arith.constant 0 : i32
    %c0_i32_1 = arith.constant 0 : i32
    return %c0_i32, %c0_i32_0 : i32, i32
  }
  func.func @transform_5(%arg0: i32) -> (i32, i32) {
    %c0_i32 = arith.constant 0 : i32
    %c0_i32_0 = arith.constant 0 : i32
    %c0_i32_1 = arith.constant 0 : i32
    return %c0_i32, %c0_i32_0 : i32, i32
  }
  func.func @transform_6(%arg0: i32) -> (i32, i32) {
    %c0_i32 = arith.constant 0 : i32
    %c0_i32_0 = arith.constant 0 : i32
    return %arg0, %c0_i32 : i32, i32
  }
}

</mosaic_0001>

<bundles_post_ra>
// kernel: tpu_custom_call.1
= control target key start
LH: loop header
LB: loop body
LE: loop exit
PB: predicated region body
PF: predicated region fallthrough
CT: control target
= control target key end

     0   :  { %11 = vsyncpa [#allocation3], 0  ;;  %s800_s0 = inlined_call_operand.hbm [shape: f32[16,128], index: 0, kind: input, shape index: {}]   ;;  %s801_s1 = inlined_call_operand.hbm [shape: f32[16,128], index: 1, kind: input, shape index: {}]   ;;  %s802_s2 = inlined_call_operand.hbm [shape: f32[128,384], index: 2, kind: input, shape index: {}]   ;;  %s803_s3 = inlined_call_operand.hbm [shape: f32[128,384], index: 3, kind: input, shape index: {}]   ;;  %s804_s4 = inlined_call_operand.vmem [shape: f32[1,384], index: 4, kind: input, shape index: {}]   ;;  %s805_s5 = inlined_call_operand.hbm [shape: f32[1,384], index: 5, kind: input, shape index: {}]   ;;  %s806_s6 = inlined_call_operand.hbm [shape: f32[16,128], index: 6, kind: output, shape index: {}]  }
   0x1   :  { %12 = vsyncpa [#allocation6], 0 }
   0x2   :  { %13 = vsyncpa [#allocation9], 0 }
   0x3   :  { %14 = vsyncpa [#allocation4], 0  ;;  %s32_s23 = sshll.u32 %s801_s1, 4  ;;  %s689_s24 = smov [#allocation5]   ;;  %s33_s23 = int_to_ptr.hbm [resolvable:$true] %s32_s23 }
   0x4   :  { %s34_s25 = sshll.u32 %s689_s24, 4  ;;  %s690_s26 = smov 128   ;;  %s35_s25 = int_to_ptr.vmem [resolvable:$true] %s34_s25 }
   0x5   :  { %s691_s27 = smov 8   ;;  %s58_s30 = sshll.u32 %s803_s3, 4  ;;  %s59_s30 = int_to_ptr.hbm [resolvable:$true] %s58_s30 }
   0x6   :  { %40 = dma.hbm_to_vmem [thread:$0]  %s33_s23, 256, %s35_s25, [#allocation6], %s690_s26, %s690_s26, %s691_s27  }
   0x7   :  { %s692_s7 = smov [#allocation8]   ;;  %s19_s1 = sshll.u32 %s800_s0, 4  ;;  %s20_s1 = int_to_ptr.hbm [resolvable:$true] %s19_s1 }
   0x8   :  { %s60_s8 = sshll.u32 %s692_s7, 4  ;;  %s693_s11 = smov 384   ;;  %s61_s8 = int_to_ptr.vmem [resolvable:$true] %s60_s8 }
   0x9   :  { %s694_s12 = smov 24   ;;  %s45_s15 = sshll.u32 %s802_s2, 4  ;;  %s46_s15 = int_to_ptr.hbm [resolvable:$true] %s45_s15 }
   0xa   :  { %66 = dma.hbm_to_vmem [thread:$0]  %s59_s30, 6144, %s61_s8, [#allocation9], %s693_s11, %s693_s11, %s694_s12  }
   0xb   :  { %s695_s16 = smov [#allocation2]   ;;  %s696_s3 = smov [#allocation7]  }
   0xc   :  { %s21_s17 = sshll.u32 %s695_s16, 4  ;;  %s47_s18 = sshll.u32 %s696_s3, 4  ;;  %s22_s17 = int_to_ptr.vmem [resolvable:$true] %s21_s17  ;;  %s48_s18 = int_to_ptr.vmem [resolvable:$true] %s47_s18 }
   0xd   :  { %27 = dma.hbm_to_vmem [thread:$0]  %s20_s1, 256, %s22_s17, [#allocation3], %s690_s26, %s690_s26, %s691_s27  }
   0xe   :  { %s74_s20 = sshll.u32 %s805_s5, 4  ;;  %s697_s21 = smov [#allocation10]   ;;  %s75_s20 = int_to_ptr.hbm [resolvable:$true] %s74_s20 }
   0xf   :  { %53 = dma.hbm_to_vmem [thread:$0]  %s46_s15, 6144, %s48_s18, [#allocation6], %s693_s11, %s693_s11, %s694_s12  }
  0x10   :  { %s76_s22 = sshll.u32 %s697_s21, 4  ;;  %s77_s22 = int_to_ptr.vmem [resolvable:$true] %s76_s22 }
  0x11   :  { %79 = dma.hbm_to_vmem [thread:$0]  %s75_s20, 48, %s77_s22, [#allocation9]  }
  0x12   :  { %681 = dma.done.wait [#allocation3], 256  }
  0x13   :  { %682 = vsyncadd [#allocation3], 4294967040 }
  0x14   :  { %683 = dma.done.wait [#allocation6], 6400  }
  0x15   :  { %684 = vsyncadd [#allocation6], 4294960896 }
  0x16   :  { %685 = dma.done.wait [#allocation9], 6192  }
  0x17   :  { %686 = vsyncadd [#allocation9], 4294961104  ;;  %v149_v0 = vld [vmem:[#allocation7 + $0x168] sm:$0xff]  ;;  %v151_v1 = vld [vmem:[#allocation7 + $0x178] sm:$0xff]  ;;  %s456_s28 = sshll.u32 %s806_s6, 4  ;;  %s457_s28 = int_to_ptr.hbm [resolvable:$true] %s456_s28 }
  0x18   :  { %v274_v2 = vld [vmem:[#allocation8 + $0x168] sm:$0xff]  ;;  %160 = vmatpush.msra.mxu0 %v149_v0  ;;  %206 = vmatpush.msra.mxu2 %v151_v1  ;;  %v146_v3 = vld [vmem:[#allocation7 + $0x150] sm:$0xff]  ;;  %v148_v4 = vld [vmem:[#allocation7 + $0x160] sm:$0xff] }
  0x19   :  { %v271_v5 = vld [vmem:[#allocation8 + $0x150] sm:$0xff]  ;;  %285 = vmatpush.msra.mxu3 %v274_v2  ;;  %v143_v6 = vld [vmem:[#allocation7 + $0x138] sm:$0xff]  ;;  %v145_v7 = vld [vmem:[#allocation7 + $0x148] sm:$0xff] }
  0x1a   :  { %161 = vmatpush.msra.mxu0 %v146_v3  ;;  %207 = vmatpush.msra.mxu2 %v148_v4  ;;  %v268_v8 = vld [vmem:[#allocation8 + $0x138] sm:$0xff]  ;;  %v150_v9 = vld [vmem:[#allocation7 + $0x170] sm:$0xff]  ;;  %v140_v10 = vld [vmem:[#allocation7 + $0x120] sm:$0xff] }
  0x1b   :  { %286 = vmatpush.msra.mxu3 %v271_v5  ;;  %183 = vmatpush.msra.mxu1 %v150_v9  ;;  %v142_v11 = vld [vmem:[#allocation7 + $0x130] sm:$0xff]  ;;  %v147_v12 = vld [vmem:[#allocation7 + $0x158] sm:$0xff]  ;;  %v265_v13 = vld [vmem:[#allocation8 + $0x120] sm:$0xff] }
  0x1c   :  { %162 = vmatpush.msra.mxu0 %v143_v6  ;;  %208 = vmatpush.msra.mxu2 %v145_v7  ;;  %v144_v14 = vld [vmem:[#allocation7 + $0x140] sm:$0xff]  ;;  %v137_v15 = vld [vmem:[#allocation7 + $0x108] sm:$0xff]  ;;  %v139_v16 = vld [vmem:[#allocation7 + $0x118] sm:$0xff] }
  0x1d   :  { %287 = vmatpush.msra.mxu3 %v268_v8  ;;  %184 = vmatpush.msra.mxu1 %v147_v12  ;;  %v262_v17 = vld [vmem:[#allocation8 + $0x108] sm:$0xff]  ;;  %v134_v19 = vld [vmem:[#allocation7 + $0xf0] sm:$0xff]  ;;  %v136_v20 = vld [vmem:[#allocation7 + $0x100] sm:$0xff] }
  0x1e   :  { %163 = vmatpush.msra.mxu0 %v140_v10  ;;  %209 = vmatpush.msra.mxu2 %v142_v11  ;;  %v141_v18 = vld [vmem:[#allocation7 + $0x128] sm:$0xff]  ;;  %v259_v21 = vld [vmem:[#allocation8 + $0xf0] sm:$0xff]  ;;  %v131_v23 = vld [vmem:[#allocation7 + $0xd8] sm:$0xff] }
  0x1f   :  { %288 = vmatpush.msra.mxu3 %v265_v13  ;;  %185 = vmatpush.msra.mxu1 %v144_v14  ;;  %v138_v22 = vld [vmem:[#allocation7 + $0x110] sm:$0xff]  ;;  %v133_v24 = vld [vmem:[#allocation7 + $0xe8] sm:$0xff]  ;;  %v256_v25 = vld [vmem:[#allocation8 + $0xd8] sm:$0xff] }
  0x20   :  { %164 = vmatpush.msra.mxu0 %v137_v15  ;;  %210 = vmatpush.msra.mxu2 %v139_v16  ;;  %v135_v26 = vld [vmem:[#allocation7 + $0xf8] sm:$0xff]  ;;  %v128_v27 = vld [vmem:[#allocation7 + $0xc0] sm:$0xff]  ;;  %v130_v28 = vld [vmem:[#allocation7 + $0xd0] sm:$0xff] }
  0x21   :  { %289 = vmatpush.msra.mxu3 %v262_v17  ;;  %186 = vmatpush.msra.mxu1 %v141_v18  ;;  %v253_v29 = vld [vmem:[#allocation8 + $0xc0] sm:$0xff]  ;;  %v125_v31 = vld [vmem:[#allocation7 + $0xa8] sm:$0xff]  ;;  %v127_v32 = vld [vmem:[#allocation7 + $0xb8] sm:$0xff] }
  0x22   :  { %165 = vmatpush.msra.mxu0 %v134_v19  ;;  %211 = vmatpush.msra.mxu2 %v136_v20  ;;  %v132_v30 = vld [vmem:[#allocation7 + $0xe0] sm:$0xff]  ;;  %v250_v33 = vld [vmem:[#allocation8 + $0xa8] sm:$0xff]  ;;  %v122_v35 = vld [vmem:[#allocation7 + $0x90] sm:$0xff] }
  0x23   :  { %290 = vmatpush.msra.mxu3 %v259_v21  ;;  %187 = vmatpush.msra.mxu1 %v138_v22  ;;  %v129_v34 = vld [vmem:[#allocation7 + $0xc8] sm:$0xff]  ;;  %v124_v36 = vld [vmem:[#allocation7 + $0xa0] sm:$0xff]  ;;  %v247_v37 = vld [vmem:[#allocation8 + $0x90] sm:$0xff] }
  0x24   :  { %166 = vmatpush.msra.mxu0 %v131_v23  ;;  %212 = vmatpush.msra.mxu2 %v133_v24  ;;  %v126_v38 = vld [vmem:[#allocation7 + $0xb0] sm:$0xff]  ;;  %v119_v39 = vld [vmem:[#allocation7 + $0x78] sm:$0xff]  ;;  %v121_v40 = vld [vmem:[#allocation7 + $0x88] sm:$0xff] }
  0x25   :  { %291 = vmatpush.msra.mxu3 %v256_v25  ;;  %188 = vmatpush.msra.mxu1 %v135_v26  ;;  %v244_v41 = vld [vmem:[#allocation8 + $0x78] sm:$0xff]  ;;  %v116_v43 = vld [vmem:[#allocation7 + $0x60] sm:$0xff]  ;;  %v118_v44 = vld [vmem:[#allocation7 + $0x70] sm:$0xff] }
  0x26   :  { %167 = vmatpush.msra.mxu0 %v128_v27  ;;  %213 = vmatpush.msra.mxu2 %v130_v28  ;;  %v123_v42 = vld [vmem:[#allocation7 + $0x98] sm:$0xff]  ;;  %v241_v45 = vld [vmem:[#allocation8 + $0x60] sm:$0xff]  ;;  %v113_v47 = vld [vmem:[#allocation7 + $0x48] sm:$0xff] }
  0x27   :  { %292 = vmatpush.msra.mxu3 %v253_v29  ;;  %189 = vmatpush.msra.mxu1 %v132_v30  ;;  %v120_v46 = vld [vmem:[#allocation7 + $0x80] sm:$0xff]  ;;  %v115_v48 = vld [vmem:[#allocation7 + $0x58] sm:$0xff]  ;;  %v238_v49 = vld [vmem:[#allocation8 + $0x48] sm:$0xff] }
  0x28   :  { %168 = vmatpush.msra.mxu0 %v125_v31  ;;  %214 = vmatpush.msra.mxu2 %v127_v32  ;;  %v117_v50 = vld [vmem:[#allocation7 + $0x68] sm:$0xff]  ;;  %v110_v51 = vld [vmem:[#allocation7 + $0x30] sm:$0xff]  ;;  %v112_v52 = vld [vmem:[#allocation7 + $0x40] sm:$0xff] }
  0x29   :  { %293 = vmatpush.msra.mxu3 %v250_v33  ;;  %190 = vmatpush.msra.mxu1 %v129_v34  ;;  %v235_v53 = vld [vmem:[#allocation8 + $0x30] sm:$0xff]  ;;  %v107_v55 = vld [vmem:[#allocation7 + $0x18] sm:$0xff]  ;;  %v109_v56 = vld [vmem:[#allocation7 + $0x28] sm:$0xff] }
  0x2a   :  { %169 = vmatpush.msra.mxu0 %v122_v35  ;;  %215 = vmatpush.msra.mxu2 %v124_v36  ;;  %v114_v54 = vld [vmem:[#allocation7 + $0x50] sm:$0xff]  ;;  %v232_v57 = vld [vmem:[#allocation8 + $0x18] sm:$0xff]  ;;  %v104_v59 = vld [vmem:[#allocation7] sm:$0xff] }
  0x2b   :  { %294 = vmatpush.msra.mxu3 %v247_v37  ;;  %191 = vmatpush.msra.mxu1 %v126_v38  ;;  %v111_v58 = vld [vmem:[#allocation7 + $0x38] sm:$0xff]  ;;  %v106_v60 = vld [vmem:[#allocation7 + $0x10] sm:$0xff]  ;;  %v229_v61 = vld [vmem:[#allocation8] sm:$0xff] }
  0x2c   :  { %170 = vmatpush.msra.mxu0 %v119_v39  ;;  %216 = vmatpush.msra.mxu2 %v121_v40  ;;  %v275_v62 = vld [vmem:[#allocation8 + $0x170] sm:$0xff]  ;;  %v108_v0 = vld [vmem:[#allocation7 + $0x20] sm:$0xff]  ;;  %v272_v1 = vld [vmem:[#allocation8 + $0x158] sm:$0xff] }
  0x2d   :  { %295 = vmatpush.msra.mxu3 %v244_v41  ;;  %192 = vmatpush.msra.mxu1 %v123_v42  ;;  %v755_v63 = vld [vmem:[#allocation5] sm:$0xff]  ;;  %v757_v2 = vld [vmem:[#allocation2] sm:$0xff]  ;;  %v105_v3 = vld [vmem:[#allocation7 + $0x8] sm:$0xff] }
  0x2e   :  { %171 = vmatpush.msra.mxu0 %v116_v43  ;;  %217 = vmatpush.msra.mxu2 %v118_v44  ;;  %v269_v4 = vld [vmem:[#allocation8 + $0x140] sm:$0xff]  ;;  %v276_v5 = vld [vmem:[#allocation8 + $0x178] sm:$0xff]  ;;  %v266_v6 = vld [vmem:[#allocation8 + $0x128] sm:$0xff] }
  0x2f   :  { %296 = vmatpush.msra.mxu3 %v241_v45  ;;  %193 = vmatpush.msra.mxu1 %v120_v46  ;;  %v273_v7 = vld [vmem:[#allocation8 + $0x160] sm:$0xff]  ;;  %v263_v8 = vld [vmem:[#allocation8 + $0x110] sm:$0xff]  ;;  %v761_v9 = vld [vmem:[#allocation5 + $0x8] sm:$0xff] }
  0x30   :  { %172 = vmatpush.msra.mxu0 %v113_v47  ;;  %218 = vmatpush.msra.mxu2 %v115_v48  ;;  %v270_v10 = vld [vmem:[#allocation8 + $0x148] sm:$0xff]  ;;  %v260_v11 = vld [vmem:[#allocation8 + $0xf8] sm:$0xff]  ;;  %v267_v12 = vld [vmem:[#allocation8 + $0x130] sm:$0xff] }
  0x31   :  { %297 = vmatpush.msra.mxu3 %v238_v49  ;;  %194 = vmatpush.msra.mxu1 %v117_v50  ;;  %v257_v13 = vld [vmem:[#allocation8 + $0xe0] sm:$0xff]  ;;  %v264_v14 = vld [vmem:[#allocation8 + $0x118] sm:$0xff]  ;;  %v101_v15 = vld [vmem:[#allocation2 + $0x8] sm:$0xff] }
  0x32   :  { %173 = vmatpush.msra.mxu0 %v110_v51  ;;  %219 = vmatpush.msra.mxu2 %v112_v52  ;;  %v254_v16 = vld [vmem:[#allocation8 + $0xc8] sm:$0xff]  ;;  %v261_v17 = vld [vmem:[#allocation8 + $0x100] sm:$0xff]  ;;  %v251_v18 = vld [vmem:[#allocation8 + $0xb0] sm:$0xff] }
  0x33   :  { %298 = vmatpush.msra.mxu3 %v235_v53  ;;  %195 = vmatpush.msra.mxu1 %v114_v54  ;;  %v258_v19 = vld [vmem:[#allocation8 + $0xe8] sm:$0xff]  ;;  %v248_v20 = vld [vmem:[#allocation8 + $0x98] sm:$0xff]  ;;  %v255_v21 = vld [vmem:[#allocation8 + $0xd0] sm:$0xff] }
  0x34   :  { %174 = vmatpush.msra.mxu0 %v107_v55  ;;  %220 = vmatpush.msra.mxu2 %v109_v56  ;;  %v245_v22 = vld [vmem:[#allocation8 + $0x80] sm:$0xff]  ;;  %v252_v23 = vld [vmem:[#allocation8 + $0xb8] sm:$0xff]  ;;  %v242_v24 = vld [vmem:[#allocation8 + $0x68] sm:$0xff] }
  0x35   :  { %299 = vmatpush.msra.mxu3 %v232_v57  ;;  %196 = vmatpush.msra.mxu1 %v111_v58  ;;  %v249_v25 = vld [vmem:[#allocation8 + $0xa0] sm:$0xff]  ;;  %v239_v26 = vld [vmem:[#allocation8 + $0x50] sm:$0xff]  ;;  %v246_v27 = vld [vmem:[#allocation8 + $0x88] sm:$0xff] }
  0x36   :  { %175 = vmatpush.msra.mxu0 %v104_v59  ;;  %221 = vmatpush.msra.mxu2 %v106_v60  ;;  %v236_v28 = vld [vmem:[#allocation8 + $0x38] sm:$0xff]  ;;  %v243_v29 = vld [vmem:[#allocation8 + $0x70] sm:$0xff]  ;;  %v233_v30 = vld [vmem:[#allocation8 + $0x20] sm:$0xff] }
  0x37   :  { %300 = vmatpush.msra.mxu3 %v229_v61  ;;  %197 = vmatpush.msra.mxu1 %v108_v0  ;;  %v240_v31 = vld [vmem:[#allocation8 + $0x58] sm:$0xff]  ;;  %v230_v32 = vld [vmem:[#allocation8 + $0x8] sm:$0xff]  ;;  %v237_v33 = vld [vmem:[#allocation8 + $0x40] sm:$0xff] }
  0x38   :  { %308 = vmatpush.msrb.mxu0 %v275_v62  ;;  %301 = vmatmul.f32.vlgmr.msra.gmra.mxu3 %v755_v63  ;;  %v234_v34 = vld [vmem:[#allocation8 + $0x28] sm:$0xff]  ;;  %v231_v35 = vld [vmem:[#allocation8 + $0x10] sm:$0xff]  ;;  %v773_v36 = vld [vmem:[%s804_s4] sm:$0x7]  ;;  %s698_s4 = smov [#allocation11]  }
  0x39   :  { %475 = vmatpush.msrb.mxu2 %v275_v62  ;;  %176 = vmatmul.f32.vlgmr.msra.gmra.mxu0 %v757_v2  ;;  %v775_v37 = vld [vmem:[#allocation10] sm:$0x7]  ;;  %v154_v38 = vperm.slane %v773_v36, 0  ;;  %v155_v59 = vperm.slane %v773_v36, 1  ;;  %s454_s23 = sshll.u32 %s698_s4, 4  ;;  %s455_s23 = int_to_ptr.vmem [resolvable:$true] %s454_s23 }
  0x3a   :  { %309 = vmatpush.msrb.mxu0 %v272_v1  ;;  %198 = vmatpush.msra.mxu1 %v105_v3  ;;  %v279_v40 = vperm.slane %v775_v37, 0  ;;  %v280_v61 = vperm.slane %v775_v37, 1 }
  0x3b   :  { %476 = vmatpush.msrb.mxu2 %v272_v1  ;;  %491 = vmatpush.msrb.mxu3 %v276_v5 }
  0x3c   :  { %310 = vmatpush.msrb.mxu0 %v269_v4  ;;  %331 = vmatpush.msrb.mxu1 %v276_v5 }
  0x3d   :  { %477 = vmatpush.msrb.mxu2 %v269_v4  ;;  %492 = vmatpush.msrb.mxu3 %v273_v7 }
  0x3e   :  { %311 = vmatpush.msrb.mxu0 %v266_v6  ;;  %332 = vmatpush.msrb.mxu1 %v273_v7 }
  0x3f   :  { %478 = vmatpush.msrb.mxu2 %v266_v6  ;;  %493 = vmatpush.msrb.mxu3 %v270_v10 }
  0x40   :  { %312 = vmatpush.msrb.mxu0 %v263_v8  ;;  %304 = vmatmul.f32.gmra.mxu3 %v761_v9 }
  0x41   :  { %479 = vmatpush.msrb.mxu2 %v263_v8  ;;  %333 = vmatpush.msrb.mxu1 %v270_v10 }
  0x42   :  { %313 = vmatpush.msrb.mxu0 %v260_v11  ;;  %494 = vmatpush.msrb.mxu3 %v267_v12 }
  0x43   :  { %480 = vmatpush.msrb.mxu2 %v260_v11  ;;  %334 = vmatpush.msrb.mxu1 %v267_v12 }
  0x44   :  { %314 = vmatpush.msrb.mxu0 %v257_v13  ;;  %222 = vmatmul.f32.vlgmr.msra.gmra.mxu2 %v757_v2 }
  0x45   :  { %481 = vmatpush.msrb.mxu2 %v257_v13  ;;  %335 = vmatpush.msrb.mxu1 %v264_v14 }
  0x46   :  { %179 = vmatmul.f32.gmra.mxu0 %v101_v15  ;;  %495 = vmatpush.msrb.mxu3 %v264_v14 }
  0x47   :  { %315 = vmatpush.msrb.mxu0 %v254_v16  ;;  %482 = vmatpush.msrb.mxu2 %v254_v16 }
  0x48   :  { %336 = vmatpush.msrb.mxu1 %v261_v17  ;;  %496 = vmatpush.msrb.mxu3 %v261_v17 }
  0x49   :  { %316 = vmatpush.msrb.mxu0 %v251_v18  ;;  %483 = vmatpush.msrb.mxu2 %v251_v18 }
  0x4a   :  { %337 = vmatpush.msrb.mxu1 %v258_v19  ;;  %497 = vmatpush.msrb.mxu3 %v258_v19 }
  0x4b   :  { %317 = vmatpush.msrb.mxu0 %v248_v20  ;;  %484 = vmatpush.msrb.mxu2 %v248_v20 }
  0x4c   :  { %338 = vmatpush.msrb.mxu1 %v255_v21  ;;  %498 = vmatpush.msrb.mxu3 %v255_v21  ;;  %v281_v21 = vperm.slane %v775_v37, 2 }
  0x4d   :  { %318 = vmatpush.msrb.mxu0 %v245_v22  ;;  %199 = vmatmul.f32.vlgmr.msra.gmra.mxu1 %v757_v2 }
  0x4e   :  { %485 = vmatpush.msrb.mxu2 %v245_v22  ;;  %339 = vmatpush.msrb.mxu1 %v252_v23 }
  0x4f   :  { %319 = vmatpush.msrb.mxu0 %v242_v24  ;;  %225 = vmatmul.f32.gmra.mxu2 %v101_v15 }
  0x50   :  { %486 = vmatpush.msrb.mxu2 %v242_v24  ;;  %499 = vmatpush.msrb.mxu3 %v252_v23 }
  0x51   :  { %340 = vmatpush.msrb.mxu1 %v249_v25  ;;  %320 = vmatpush.msrb.mxu0 %v239_v26 }
  0x52   :  { %487 = vmatpush.msrb.mxu2 %v239_v26  ;;  %500 = vmatpush.msrb.mxu3 %v249_v25 }
  0x53   :  { %341 = vmatpush.msrb.mxu1 %v246_v27  ;;  %321 = vmatpush.msrb.mxu0 %v236_v28 }
  0x54   :  { %488 = vmatpush.msrb.mxu2 %v236_v28  ;;  %501 = vmatpush.msrb.mxu3 %v246_v27 }
  0x55   :  { %342 = vmatpush.msrb.mxu1 %v243_v29  ;;  %322 = vmatpush.msrb.mxu0 %v233_v30 }
  0x56   :  { %202 = vmatmul.f32.gmra.mxu1 %v101_v15  ;;  %489 = vmatpush.msrb.mxu2 %v233_v30 }
  0x57   :  { %502 = vmatpush.msrb.mxu3 %v243_v29  ;;  %343 = vmatpush.msrb.mxu1 %v240_v31 }
  0x58   :  { %323 = vmatpush.msrb.mxu0 %v230_v32  ;;  %490 = vmatpush.msrb.mxu2 %v230_v32 }
  0x59   :  { %324 = vmatmul.f32.vlgmr.msrb.gmra.mxu0 %v755_v63  ;;  %327 = vmatmul.f32.vlgmr.msrb.gmra.mxu2 %v761_v9 }
  0x5a   :  { %503 = vmatpush.msrb.mxu3 %v240_v31  ;;  %344 = vmatpush.msrb.mxu1 %v237_v33 }
  0x5c   :  { %504 = vmatpush.msrb.mxu3 %v237_v33  ;;  %345 = vmatpush.msrb.mxu1 %v234_v34  ;;  %v156_v33 = vperm.slane %v773_v36, 2 }
  0x5e   :  { %505 = vmatpush.msrb.mxu3 %v234_v34  ;;  %346 = vmatpush.msrb.mxu1 %v231_v35 }
  0x5f   :  { %347 = vmatmul.f32.vlgmr.msrb.gmra.mxu1 %v755_v63 }
  0x60   :  { %506 = vmatpush.msrb.mxu3 %v231_v35 }
  0x61   :  { %350 = vmatmul.f32.vlgmr.msrb.gmra.mxu3 %v761_v9 }
  0xb6   :  { %v177_v39 = vpop.f32.mrf.mxu0 }
  0xb7   :  { %v178_v41 = vadd.f32 %v177_v39, %v154_v38 }
  0xbb   :  { %v302_v42 = vpop.f32.mrf.mxu3 }
  0xbc   :  { %v303_v43 = vadd.f32 %v302_v42, %v279_v40 }
  0xbe   :  { %v354_v44 = vadd.f32 %v303_v43, %v178_v41 }
  0xc0   :  { %v471_v45 = vmul.f32 -1.442695, %v354_v44 }
  0xc2   :  { %517 = vpow2.f32 %v471_v45 }
  0xc3   :  { %v180_v46 = vpop.f32.mrf.mxu0  ;;  %v305_v48 = vpop.f32.mrf.mxu3 }
  0xc4   :  { %v181_v47 = vadd.f32 %v180_v46, %v154_v38  ;;  %v306_v49 = vadd.f32 %v305_v48, %v279_v40 }
  0xc6   :  { %v355_v50 = vadd.f32 %v306_v49, %v181_v47 }
  0xc7   :  { %v223_v54 = vpop.f32.mrf.mxu2 }
  0xc8   :  { %v518_v51 = vpop.eup %517  ;;  %v472_v52 = vmul.f32 -1.442695, %v355_v50  ;;  %v224_v42 = vadd.f32 %v223_v54, %v156_v33 }
  0xc9   :  { %v362_v53 = vadd.f32 1.0, %v518_v51 }
  0xca   :  { %519 = vpow2.f32 %v472_v52  ;;  %v200_v55 = vpop.f32.mrf.mxu1 }
  0xcb   :  { %521 = vrcp.f32 %v362_v53  ;;  %v201_v1 = vadd.f32 %v200_v55, %v155_v59  ;;  %vm369_vm0 = vweird.f32 %v362_v53  ;;  %v375_v14 = vand.u32 2147483648, %v362_v53 }
  0xcc   :  { %v373_v18 = vand.u32 2147483647, %v362_v53 }
  0xcd   :  { %v376_v24 = vor.u32 1.1754944e-38, %v375_v14 }
  0xce   :  { %vm374_vm3 = vcmp.eq.f32.partialorder %v373_v18, 8.507059e+37 }
  0xd0   :  { %v520_v56 = vpop.eup %519 }
  0xd1   :  { %v522_v57 = vpop.eup %521  ;;  %v363_v58 = vadd.f32 1.0, %v520_v56 }
  0xd2   :  { %v780_v60 = vpop.f32.mrf.mxu2  ;;  %v365_v62 = vmul.f32 %v522_v57, %v362_v53  ;;  %vm370_vm1 = vweird.f32 %v522_v57 }
  0xd3   :  { %523 = vrcp.f32 %v363_v58  ;;  %v203_v5 = vpop.f32.mrf.mxu1  ;;  %vm783_vm2 = vmor %vm369_vm0, %vm370_vm1  ;;  %vm384_vm4 = vweird.f32 %v363_v58  ;;  %v390_v29 = vand.u32 2147483648, %v363_v58  ;;  %v388_v32 = vand.u32 2147483647, %v363_v58 }
  0xd4   :  { %v366_v3 = vsub.f32 1.0, %v365_v62  ;;  %v204_v7 = vadd.f32 %v203_v5, %v155_v59  ;;  %v227_v52 = vadd.f32 %v780_v60, %v156_v33 }
  0xd5   :  { %v391_v38 = vor.u32 1.1754944e-38, %v390_v29  ;;  %vm389_vm7 = vcmp.eq.f32.partialorder %v388_v32, 8.507059e+37 }
  0xd6   :  { %v325_v0 = vpop.f32.mrf.mxu0  ;;  %v367_v11 = vmul.f32 %v522_v57, %v366_v3 }
  0xd7   :  { %v326_v2 = vadd.f32 %v325_v0, %v280_v61 }
  0xd8   :  { %v368_v17 = vadd.f32 %v522_v57, %v367_v11 }
  0xd9   :  { %v524_v4 = vpop.eup %523  ;;  %v394_v6 = vadd.f32 %v326_v2, %v201_v1 }
  0xda   :  { %v380_v10 = vmul.f32 %v524_v4, %v363_v58  ;;  %v372_v27 = vsel %vm783_vm2, %v522_v57, %v368_v17  ;;  %vm385_vm5 = vweird.f32 %v524_v4 }
  0xdb   :  { %v473_v8 = vmul.f32 -1.442695, %v394_v6  ;;  %v377_v30 = vsel %vm374_vm3, %v376_v24, %v372_v27  ;;  %vm386_vm6 = vmor %vm384_vm4, %vm385_vm5 }
  0xdc   :  { %v328_v12 = vpop.f32.mrf.mxu2  ;;  %v381_v16 = vsub.f32 1.0, %v380_v10  ;;  %v348_v23 = vpop.f32.mrf.mxu1 }
  0xdd   :  { %525 = vpow2.f32 %v473_v8  ;;  %v329_v13 = vadd.f32 %v328_v12, %v280_v61  ;;  %v349_v28 = vadd.f32 %v348_v23, %v281_v21 }
  0xde   :  { %v382_v25 = vmul.f32 %v524_v4, %v381_v16 }
  0xdf   :  { %v395_v15 = vadd.f32 %v329_v13, %v204_v7  ;;  %v434_v35 = vmul.f32 %v377_v30, %v349_v28 }
  0xe0   :  { %v383_v31 = vadd.f32 %v524_v4, %v382_v25 }
  0xe1   :  { %v474_v20 = vmul.f32 -1.442695, %v395_v15  ;;  %v436_v45 = vadd.f32 %v434_v35, %v224_v42 }
  0xe2   :  { %v387_v40 = vsel %vm386_vm6, %v524_v4, %v383_v31 }
  0xe3   :  { %v526_v22 = vpop.eup %525  ;;  %527 = vpow2.f32 %v474_v20  ;;  %v392_v46 = vsel %vm389_vm7, %v391_v38, %v387_v40 }
  0xe4   :  { %v402_v26 = vadd.f32 1.0, %v526_v22  ;;  %v351_v37 = vpop.f32.mrf.mxu3 }
  0xe5   :  { %v352_v44 = vadd.f32 %v351_v37, %v281_v21 }
  0xe6   :  { %529 = vrcp.f32 %v402_v26  ;;  %v415_v48 = vand.u32 2147483648, %v402_v26  ;;  %v413_v36 = vand.u32 2147483647, %v402_v26  ;;  %vm409_vm9 = vweird.f32 %v402_v26 }
  0xe7   :  { %v435_v49 = vmul.f32 %v392_v46, %v352_v44 }
  0xe8   :  { %v416_v54 = vor.u32 1.1754944e-38, %v415_v48  ;;  %vm414_vm11 = vcmp.eq.f32.partialorder %v413_v36, 8.507059e+37 }
  0xe9   :  { %v528_v34 = vpop.eup %527  ;;  %v437_v56 = vadd.f32 %v435_v49, %v227_v52 }
  0xea   :  { %v403_v39 = vadd.f32 1.0, %v528_v34 }
  0xec   :  { %v530_v41 = vpop.eup %529  ;;  %531 = vrcp.f32 %v403_v39  ;;  %v430_v61 = vand.u32 2147483648, %v403_v39  ;;  %v428_v2 = vand.u32 2147483647, %v403_v39  ;;  %vm424_vm13 = vweird.f32 %v403_v39 }
  0xed   :  { %v405_v43 = vmul.f32 %v530_v41, %v402_v26  ;;  %vm410_vm8 = vweird.f32 %v530_v41  ;;  %533 = vtanh.f32 %v436_v45 }
  0xee   :  { %vm411_vm10 = vmor %vm409_vm9, %vm410_vm8  ;;  %535 = vtanh.f32 %v437_v56  ;;  %v431_v5 = vor.u32 1.1754944e-38, %v430_v61  ;;  %vm429_vm15 = vcmp.eq.f32.partialorder %v428_v2, 8.507059e+37 }
  0xef   :  { %v406_v47 = vsub.f32 1.0, %v405_v43 }
  0xf1   :  { %v407_v50 = vmul.f32 %v530_v41, %v406_v47 }
  0xf2   :  { %v532_v51 = vpop.eup %531 }
  0xf3   :  { %v408_v53 = vadd.f32 %v530_v41, %v407_v50  ;;  %v420_v55 = vmul.f32 %v532_v51, %v403_v39  ;;  %v534_v0 = vpop.eup %533  ;;  %vm425_vm12 = vweird.f32 %v532_v51 }
  0xf4   :  { %vm426_vm14 = vmor %vm424_vm13, %vm425_vm12  ;;  %v536_v11 = vpop.eup %535 }
  0xf5   :  { %v412_v57 = vsel %vm411_vm10, %v530_v41, %v408_v53  ;;  %v421_v58 = vsub.f32 1.0, %v420_v55 }
  0xf6   :  { %v417_v59 = vsel %vm414_vm11, %v416_v54, %v412_v57 }
  0xf7   :  { %v440_v62 = vsub.f32 1.0, %v417_v59  ;;  %v422_v1 = vmul.f32 %v532_v51, %v421_v58  ;;  %v444_v60 = vmul.f32 %v417_v59, %v755_v63 }
  0xf9   :  { %v442_v3 = vmul.f32 %v534_v0, %v440_v62  ;;  %v423_v4 = vadd.f32 %v532_v51, %v422_v1 }
  0xfb   :  { %v446_v6 = vadd.f32 %v444_v60, %v442_v3  ;;  %v427_v7 = vsel %vm426_vm14, %v532_v51, %v423_v4 }
  0xfc   :  { %v432_v8 = vsel %vm429_vm15, %v431_v5, %v427_v7 }
  0xfd   :  { %448 = vst [vmem:[#allocation11] sm:$0xff] %v446_v6  ;;  %v441_v10 = vsub.f32 1.0, %v432_v8  ;;  %v445_v63 = vmul.f32 %v432_v8, %v761_v9 }
  0xff   :  { %v443_v12 = vmul.f32 %v536_v11, %v441_v10 }
 0x101   :  { %v447_v13 = vadd.f32 %v445_v63, %v443_v12 }
 0x103   :  { %449 = vst [vmem:[#allocation11 + $0x8] sm:$0xff] %v447_v13 }
 0x104   :  { %462 = dma.vmem_to_hbm [thread:$0]  %s455_s23, 256, %s457_s28, [#allocation4], %s690_s26, %s690_s26, %s691_s27  }
 0x105   :  { %687 = dma.done.wait [#allocation4], 256  }
 0x106   :  { %688 = vsyncadd [#allocation4], 4294967040 }
 0x107   :  { %467 = vsyncpa [#allocation3], 1 }
 0x108   :  { %468 = vsyncpa [#allocation6], 1 }
 0x109   :  { %469 = vsyncpa [#allocation9], 1 }
 0x10a   :  { %470 = vsyncpa [#allocation4], 1 }

</bundles_post_ra>
